<compile_context>
chip_gen: v7x
topology: tpu7x:2x2x1
jax: 0.10.0
libtpu: 0.0.40
codegen_flags: <defaults>
</compile_context>

<pallas_src>
import functools

import jax
import jax.numpy as jnp
import numpy as np
from jax.experimental import pallas as pl
from jax.experimental.pallas import tpu as pltpu


# ----------------------------- kernels ------------------------------------ #

def _residual_kernel_adapter(x_ref, w1wa_ref, w2_ref, c_ref, o_ref):
    """Batch tile when input_size != output_size (fused linear1|adapter)."""
    d_out = o_ref.shape[-1]
    x32 = x_ref[...]                          # (TB, Din) f32 from HBM
    x = x32.astype(jnp.bfloat16)              # cast hidden under MXU
    c = c_ref[...]                            # (2, 2*Dout) f32: [c1|ca ; c2|0]

    # fused linear1(+BN1) and dimension_adapter: one MXU pass, N = 2*Dout
    fused = jnp.dot(x, w1wa_ref[...], preferred_element_type=jnp.float32) + c[0:1, :]
    h = jnp.maximum(fused[:, :d_out], 0.0)    # relu on the linear1 half
    ident = fused[:, d_out:]                  # adapter half (no relu)

    # dropout: identity in eval mode

    # linear2 (+ folded BN2)
    h2 = jnp.dot(h.astype(w2_ref.dtype), w2_ref[...],
                 preferred_element_type=jnp.float32) + c[1:2, :d_out]

    o_ref[...] = jnp.maximum(h2 + ident, 0.0).astype(o_ref.dtype)


def _residual_kernel_identity(x_ref, w1_ref, w2_ref, c_ref, o_ref):
    """Batch tile when input_size == output_size (identity skip, f32 x)."""
    x32 = x_ref[...]                          # (TB, D) f32
    x = x32.astype(jnp.bfloat16)
    c = c_ref[...]                            # (2, D) f32: [c1 ; c2]

    h = jnp.dot(x, w1_ref[...], preferred_element_type=jnp.float32) + c[0:1, :]
    h = jnp.maximum(h, 0.0)

    # dropout: identity in eval mode

    h2 = jnp.dot(h.astype(w2_ref.dtype), w2_ref[...],
                 preferred_element_type=jnp.float32) + c[1:2, :]

    # full-precision f32 residual add
    o_ref[...] = jnp.maximum(h2 + x32, 0.0).astype(o_ref.dtype)


# ----------------------------- param folding (hoisted, one-time) ----------- #

def fold_residual_block_params(params, eps=1e-5):
    """Fold eval-mode BatchNorm into the linears and cast weights to bf16.

    Run ONCE per checkpoint; the result is what residual_block_forward consumes.
    y = (x@W + b)*s + t  ==  x @ (W*s) + (b*s + t)
    """
    d_in, d_out = params["w1"].shape
    s1 = params["gamma1"] / jnp.sqrt(params["rvar1"] + eps)
    t1 = params["beta1"] - params["rmean1"] * s1
    s2 = params["gamma2"] / jnp.sqrt(params["rvar2"] + eps)
    t2 = params["beta2"] - params["rmean2"] * s2

    w1f = (params["w1"] * s1[None, :]).astype(jnp.bfloat16)      # (Din, Dout)
    c1 = (params["b1"] * s1 + t1).astype(jnp.float32)
    w2f = (params["w2"] * s2[None, :]).astype(jnp.bfloat16)      # (Dout, Dout)
    c2 = (params["b2"] * s2 + t2).astype(jnp.float32)

    match_dimension = d_in != d_out
    if match_dimension:
        wa = params["wa"].astype(jnp.bfloat16)                   # (Din, Dout)
        ca = params["ba"].astype(jnp.float32)
        w1wa = jnp.concatenate([w1f, wa], axis=1)                # (Din, 2*Dout) bf16
        cpack = jnp.stack([jnp.concatenate([c1, ca]),
                           jnp.concatenate([c2, jnp.zeros_like(c2)])])  # (2, 2*Dout)
        return {"match_dimension": True, "d_in": d_in, "d_out": d_out,
                "w1": w1wa, "w2": w2f, "c": cpack}
    cpack = jnp.stack([c1, c2])                                  # (2, Dout)
    return {"match_dimension": False, "d_in": d_in, "d_out": d_out,
            "w1": w1f, "w2": w2f, "c": cpack}


# ----------------------------- forward wrapper ------------------------------ #

def residual_block_forward(x, folded, *, tile_b=256, out_dtype=jnp.float32):
    """x: [B, input_size] float32; folded: output of fold_residual_block_params.

    Returns [B, output_size] in out_dtype (default float32; bf16 halves writeback
    when the consumer tolerates it).
    """
    B, d_in = x.shape
    assert d_in == folded["d_in"], (d_in, folded["d_in"])
    d_out = folded["d_out"]
    match_dimension = folded["match_dimension"]

    # ---- batch tile policy --------------------------------------------------
    # Big tiles amortize the ~0.35us per-grid-step overhead (v5e/v6e serial
    # grid), but keep >=2 steps when the batch allows so v7x's two TensorCores
    # are both fed under dimension_semantics=("parallel",).
    tb = min(int(tile_b), B)
    if B >= 16 and tb >= B:
        tb = min(B, ((B // 2 + 7) // 8) * 8)
    tb = max(1, tb)
    grid = (pl.cdiv(B, tb),)

    w_spec = lambda shape: pl.BlockSpec(shape, lambda i: (0, 0))  # weight-resident

    if match_dimension:
        kernel = _residual_kernel_adapter
        in_specs = [
            pl.BlockSpec((tb, d_in), lambda i: (i, 0)),           # x tile (f32)
            w_spec((d_in, 2 * d_out)),                            # [w1'|wa] bf16
            w_spec((d_out, d_out)),                               # w2' bf16
            w_spec((2, 2 * d_out)),                               # [c1|ca ; c2|0] f32
        ]
    else:
        kernel = _residual_kernel_identity
        in_specs = [
            pl.BlockSpec((tb, d_in), lambda i: (i, 0)),           # x tile (f32)
            w_spec((d_in, d_out)),                                # w1' bf16
            w_spec((d_out, d_out)),                               # w2' bf16
            w_spec((2, d_out)),                                   # [c1 ; c2] f32
        ]
    operands = (x, folded["w1"], folded["w2"], folded["c"])

    # ---- cost estimate (scheduler hint) -------------------------------------
    out_isize = jnp.dtype(out_dtype).itemsize
    flops = 2 * B * d_out * (d_in + d_out) + (2 * B * d_in * d_out if match_dimension else 0)
    weight_bytes = sum(int(o.size) * o.dtype.itemsize for o in operands[1:])
    bytes_accessed = int(x.size) * 4 + weight_bytes + B * d_out * out_isize

    # ---- VMEM budgeting (generation-aware) ----------------------------------
    # Double-buffered x/out tiles + (conservatively double-buffered) resident
    # weights + f32 intermediates (fused, h, h2) inside the kernel body.
    tile_bytes = 2 * (tb * d_in * 4 + tb * d_out * out_isize)
    interm_width = 2 * d_out if match_dimension else d_out
    interm_bytes = 3 * tb * interm_width * 4
    need = 2 * weight_bytes + tile_bytes + interm_bytes

    try:
        phys_vmem = int(pltpu.get_tpu_info().vmem_capacity_bytes)
    except Exception:  # interpret mode / older runtimes
        phys_vmem = 128 << 20
    cap = min(56 << 20, (phys_vmem * 7) // 8)   # leave headroom on v7x (64 MiB/TC)

    cp_kwargs = dict(dimension_semantics=("parallel",))
    if need > (14 << 20):                        # v5e default scoped limit ~16 MiB
        cp_kwargs["vmem_limit_bytes"] = int(min(int(need * 1.25), cap))

    return pl.pallas_call(
        kernel,
        out_shape=jax.ShapeDtypeStruct((B, d_out), out_dtype),
        grid_spec=pltpu.PrefetchScalarGridSpec(
            num_scalar_prefetch=0,
            grid=grid,
            in_specs=in_specs,
            out_specs=pl.BlockSpec((tb, d_out), lambda i: (i, 0)),
        ),
        compiler_params=pltpu.CompilerParams(**cp_kwargs),
        cost_estimate=pl.CostEstimate(flops=flops, transcendentals=0,
                                      bytes_accessed=bytes_accessed),
    )(*operands)


# ----------------------------- params / reference -------------------------- #

def init_params(key, input_size, output_size):
    """PyTorch-like shapes; BN at PyTorch defaults (running stats of identity)."""
    ks = jax.random.split(key, 6)
    lim1 = 1.0 / np.sqrt(input_size)
    lim2 = 1.0 / np.sqrt(output_size)
    p = {
        # nn.Linear weight is (out, in); stored transposed (in, out) for x @ W.
        "w1": jax.random.uniform(ks[0], (input_size, output_size), jnp.float32, -lim1, lim1),
        "b1": jax.random.uniform(ks[1], (output_size,), jnp.float32, -lim1, lim1),
        "w2": jax.random.uniform(ks[2], (output_size, output_size), jnp.float32, -lim2, lim2),
        "b2": jax.random.uniform(ks[3], (output_size,), jnp.float32, -lim2, lim2),
        "gamma1": jnp.ones((output_size,), jnp.float32),
        "beta1": jnp.zeros((output_size,), jnp.float32),
        "rmean1": jnp.zeros((output_size,), jnp.float32),
        "rvar1": jnp.ones((output_size,), jnp.float32),
        "gamma2": jnp.ones((output_size,), jnp.float32),
        "beta2": jnp.zeros((output_size,), jnp.float32),
        "rmean2": jnp.zeros((output_size,), jnp.float32),
        "rvar2": jnp.ones((output_size,), jnp.float32),
    }
    if input_size != output_size:
        p["wa"] = jax.random.uniform(ks[4], (input_size, output_size), jnp.float32, -lim1, lim1)
        p["ba"] = jax.random.uniform(ks[5], (output_size,), jnp.float32, -lim1, lim1)
    return p


def reference_forward(x, params):
    """Pure-JAX f32 reference (eval-mode PyTorch semantics)."""
    eps = 1e-5
    d_in = x.shape[1]
    d_out = params["w1"].shape[1]
    h = x @ params["w1"] + params["b1"]
    h = (h - params["rmean1"]) / jnp.sqrt(params["rvar1"] + eps) * params["gamma1"] + params["beta1"]
    h = jnp.maximum(h, 0.0)
    h2 = h @ params["w2"] + params["b2"]
    h2 = (h2 - params["rmean2"]) / jnp.sqrt(params["rvar2"] + eps) * params["gamma2"] + params["beta2"]
    ident = x @ params["wa"] + params["ba"] if d_in != d_out else x
    return jnp.maximum(h2 + ident, 0.0)


# ----------------------------- demo / test --------------------------------- #

if __name__ == "__main__":
    key = jax.random.PRNGKey(0)

    # Path 1: match_dimension = True (fused linear1|adapter), 2*Dout = 256-wide MXU fill.
    kx, kp, key = jax.random.split(key, 3)
    batch, d_in, d_out = 256, 64, 128
    x = jax.random.normal(kx, (batch, d_in), jnp.float32)
    params = init_params(kp, d_in, d_out)
    folded = jax.tree_util.tree_map(jax.block_until_ready,
                                    fold_residual_block_params(params))  # one-time fold
    out = jax.block_until_ready(residual_block_forward(x, folded))
    ref = reference_forward(x, params)
    np.testing.assert_allclose(np.asarray(out), np.asarray(ref), rtol=2e-2, atol=2e-2)

    # Path 2: match_dimension = False (identity skip in full f32).
    kx2, kp2 = jax.random.split(key)
    batch2, d2 = 256, 128
    x2 = jax.random.normal(kx2, (batch2, d2), jnp.float32)
    params2 = init_params(kp2, d2, d2)
    folded2 = fold_residual_block_params(params2)
    out2 = jax.block_until_ready(residual_block_forward(x2, folded2))
    ref2 = reference_forward(x2, params2)
    np.testing.assert_allclose(np.asarray(out2), np.asarray(ref2), rtol=2e-2, atol=2e-2)

    print("KERNEL_OK")
</pallas_src>

<mosaic_0001>
module attributes {stable_mosaic.version = 11 : i64} {
  func.func @_residual_kernel_adapter(%arg0: i32, %arg1: memref<128x64xf32, #tpu.memory_space<vmem>>, %arg2: memref<64x256xbf16, #tpu.memory_space<vmem>>, %arg3: memref<128x128xbf16, #tpu.memory_space<vmem>>, %arg4: memref<2x256xf32, #tpu.memory_space<vmem>>, %arg5: memref<128x128xf32, #tpu.memory_space<vmem>>) attributes {dimension_semantics = [#tpu.dimension_semantics<parallel>], iteration_bounds = array<i64: 2>, scalar_prefetch = 0 : i64, scratch_operands = 0 : i64, tpu.core_type = #tpu.core_type<tc>, window_params = [{transform_indices = @transform_0, window_bounds = array<i64: 128, 64>}, {pipeline_mode = #tpu.pipeline_mode<synchronous>, transform_indices = @transform_1, window_bounds = array<i64: 64, 256>}, {pipeline_mode = #tpu.pipeline_mode<synchronous>, transform_indices = @transform_2, window_bounds = array<i64: 128, 128>}, {pipeline_mode = #tpu.pipeline_mode<synchronous>, transform_indices = @transform_3, window_bounds = array<i64: 2, 256>}, {transform_indices = @transform_4, window_bounds = array<i64: 128, 128>}]} {
    %c0 = arith.constant 0 : index
    %c0_0 = arith.constant 0 : index
    %0 = vector.load %arg1[%c0, %c0_0] : memref<128x64xf32, #tpu.memory_space<vmem>>, vector<128x64xf32>
    %1 = arith.truncf %0 : vector<128x64xf32> to vector<128x64xbf16>
    %c0_1 = arith.constant 0 : index
    %c0_2 = arith.constant 0 : index
    %2 = vector.load %arg4[%c0_1, %c0_2] : memref<2x256xf32, #tpu.memory_space<vmem>>, vector<2x256xf32>
    %c0_3 = arith.constant 0 : index
    %c0_4 = arith.constant 0 : index
    %3 = vector.load %arg2[%c0_3, %c0_4] : memref<64x256xbf16, #tpu.memory_space<vmem>>, vector<64x256xbf16>
    %cst = arith.constant dense<0.000000e+00> : vector<128x256xf32>
    %4 = tpu.matmul %1, %3, %cst {dimension_numbers = #tpu.dot_dimension_numbers<[1], [0], [0], [1], [0, 0, 1, 1], [], []>} : vector<128x64xbf16>, vector<64x256xbf16>, vector<128x256xf32> -> vector<128x256xf32>
    %5 = vector.extract_strided_slice %2 {offsets = [0, 0], sizes = [1, 256], strides = [1, 1]} : vector<2x256xf32> to vector<1x256xf32>
    %6 = vector.broadcast %5 : vector<1x256xf32> to vector<128x256xf32>
    %7 = arith.addf %4, %6 : vector<128x256xf32>
    %8 = vector.extract_strided_slice %7 {offsets = [0, 0], sizes = [128, 128], strides = [1, 1]} : vector<128x256xf32> to vector<128x128xf32>
    %cst_5 = arith.constant 0.000000e+00 : f32
    %9 = vector.broadcast %cst_5 : f32 to vector<128x128xf32>
    %10 = arith.maximumf %8, %9 : vector<128x128xf32>
    %11 = vector.extract_strided_slice %7 {offsets = [0, 128], sizes = [128, 128], strides = [1, 1]} : vector<128x256xf32> to vector<128x128xf32>
    %12 = arith.truncf %10 : vector<128x128xf32> to vector<128x128xbf16>
    %c0_6 = arith.constant 0 : index
    %c0_7 = arith.constant 0 : index
    %13 = vector.load %arg3[%c0_6, %c0_7] : memref<128x128xbf16, #tpu.memory_space<vmem>>, vector<128x128xbf16>
    %cst_8 = arith.constant dense<0.000000e+00> : vector<128x128xf32>
    %14 = tpu.matmul %12, %13, %cst_8 {dimension_numbers = #tpu.dot_dimension_numbers<[1], [0], [0], [1], [0, 0, 1, 1], [], []>} : vector<128x128xbf16>, vector<128x128xbf16>, vector<128x128xf32> -> vector<128x128xf32>
    %15 = vector.extract_strided_slice %2 {offsets = [1, 0], sizes = [1, 128], strides = [1, 1]} : vector<2x256xf32> to vector<1x128xf32>
    %16 = vector.broadcast %15 : vector<1x128xf32> to vector<128x128xf32>
    %17 = arith.addf %14, %16 : vector<128x128xf32>
    %18 = arith.addf %17, %11 : vector<128x128xf32>
    %cst_9 = arith.constant 0.000000e+00 : f32
    %19 = vector.broadcast %cst_9 : f32 to vector<128x128xf32>
    %20 = arith.maximumf %18, %19 : vector<128x128xf32>
    %c0_10 = arith.constant 0 : index
    %c0_11 = arith.constant 0 : index
    %21 = vector.load %arg5[%c0_10, %c0_11] : memref<128x128xf32, #tpu.memory_space<vmem>>, vector<128x128xf32>
    tpu.vector_store %arg5[%c0_10, %c0_11], %20 {strides = array<i32>} : memref<128x128xf32, #tpu.memory_space<vmem>>, vector<128x128xf32>,
    return
  }
  func.func @transform_0(%arg0: i32) -> (i32, i32) {
    %c0_i32 = arith.constant 0 : i32
    %c0_i32_0 = arith.constant 0 : i32
    return %arg0, %c0_i32 : i32, i32
  }
  func.func @transform_1(%arg0: i32) -> (i32, i32) {
    %c0_i32 = arith.constant 0 : i32
    %c0_i32_0 = arith.constant 0 : i32
    %c0_i32_1 = arith.constant 0 : i32
    return %c0_i32, %c0_i32_0 : i32, i32
  }
  func.func @transform_2(%arg0: i32) -> (i32, i32) {
    %c0_i32 = arith.constant 0 : i32
    %c0_i32_0 = arith.constant 0 : i32
    %c0_i32_1 = arith.constant 0 : i32
    return %c0_i32, %c0_i32_0 : i32, i32
  }
  func.func @transform_3(%arg0: i32) -> (i32, i32) {
    %c0_i32 = arith.constant 0 : i32
    %c0_i32_0 = arith.constant 0 : i32
    %c0_i32_1 = arith.constant 0 : i32
    return %c0_i32, %c0_i32_0 : i32, i32
  }
  func.func @transform_4(%arg0: i32) -> (i32, i32) {
    %c0_i32 = arith.constant 0 : i32
    %c0_i32_0 = arith.constant 0 : i32
    return %arg0, %c0_i32 : i32, i32
  }
}

</mosaic_0001>

<bundles_post_ra>
// kernel: tpu_custom_call.1
= control target key start
LH: loop header
LB: loop body
LE: loop exit
PB: predicated region body
PF: predicated region fallthrough
CT: control target
= control target key end

     0   :  { %9 = vsyncpa [#allocation3], 0  ;;  %s1310_s0 = inlined_call_operand.vmem [shape: f32[256,64], index: 0, kind: input, shape index: {}]   ;;  %s1311_s1 = inlined_call_operand.vmem [shape: bf16[64,256], index: 1, kind: input, shape index: {}]   ;;  %s1312_s2 = inlined_call_operand.vmem [shape: bf16[128,128], index: 2, kind: input, shape index: {}]   ;;  %s1313_s3 = inlined_call_operand.vmem [shape: f32[2,256], index: 3, kind: input, shape index: {}]   ;;  %s1314_s4 = inlined_call_operand.hbm [shape: f32[256,128], index: 4, kind: output, shape index: {}]  }
   0x1   :  { %11 = vsyncpa [#allocation3 + $0x1], 0  ;;  %s983_s15 = smov 0   ;;  %s985_s16 = smov 0  }
   0x2   :  { %s987_s17 = smov 0   ;;  %s989_s18 = smov 0  }
   0x3 LB: > { %s1004_s19 = sadd.s32 4294967295, %s952_s18   ;;  %s743_s20 = sadd.s32 4294967294, %s952_s18   ;;  %s952_s18 = sphi %s989_s18, %s1320_s18   ;;  %s948_s17 = sphi %s987_s17, %s1319_s17   ;;  %s944_s16 = sphi %s985_s16, %s1318_s16   ;;  %s940_s15 = sphi %s983_s15, %s1317_s15  }
   0x4   : > { %s1008_s21 = sadd.s32 1, %s952_s18   ;;  %s113_s22 = sadd.s32 1, %s948_s17 }
   0x5   : > { %s110_s23 = ssub.s32 %s952_s18, %s1008_s21  ;;  %p123_p0 = scmp.ne.s32.totalorder %s948_s17, %s944_s16 }
   0x6   : > { %p111_p1 = scmp.eq.s32.totalorder %s110_s23, 0  ;;  %p124_p2 = scmp.eq.s32.totalorder %s1004_s19, 1 }
   0x7   : > { %p129_p3 = scmp.ne.s32.totalorder %s944_s16, %s940_s15  ;;  %p130_p4 = scmp.eq.s32.totalorder %s743_s20, 1 }
   0x8   : > { %s1019_s24 = scalar_select %p111_p1, %s948_s17, %s113_s22  }
   0x9   : > { %p1021_p5 = por %p124_p2, %p123_p0  ;;  %p1025_p6 = por %p130_p4, %p129_p3 }
   0xa   : > { %p746_p7 = scmp.ge.s32.totalorder %s952_s18, 1  ;;  %p166_p8 = scmp.lt.s32.totalorder %s952_s18, 3 }
   0xc   : > { %p167_p9 = pnand %p746_p7, %p166_p8 }
   0xd   : > { %v870_v0 = vld [vmem:[%s1311_s1 + $0x4] ss:$8 sps:$4 sm:$0xff] (!%p167_p9)   ;;  %s748_s29 = sshll.u32 (!%p167_p9), %s1004_s19, 4  ;;  %v872_v1 = vld [vmem:[%s1311_s1] ss:$8 sps:$4 sm:$0xff] (!%p167_p9)   ;;  %v954_v2 = vmov (!%p167_p9), 0   ;;  %v234_v41 = vlaneseq (!%p167_p9) }
   0xe   : > { %170 = sbr.rel (%p167_p9) target bundleno = 542 (0x21e), region = 36  ;;  %349 = vmatprep.mubr.bf16.mxu0 (!%p167_p9), %v954_v2  ;;  %p193_p10 = scmp.lt.s32.totalorder (!%p167_p9), %s748_s29, 31  ;;  %317 = vmatprep.subr.bf16.mxu0 (!%p167_p9), %v870_v0  ;;  %v873_v3 = vld [vmem:[%s1311_s1 + $0x14] ss:$8 sps:$4 sm:$0xff] (!%p167_p9)   ;;  %v875_v4 = vld [vmem:[%s1311_s1 + $0x10] ss:$8 sps:$4 sm:$0xff] (!%p167_p9)  }
   0xf   : > { %318 = vmatpush1.bf16.msra.mxu0 (!%p167_p9), %v872_v1  ;;  %v876_v5 = vld [vmem:[%s1311_s1 + $0x24] ss:$8 sps:$4 sm:$0xff] (!%p167_p9)   ;;  %v878_v7 = vld [vmem:[%s1311_s1 + $0x20] ss:$8 sps:$4 sm:$0xff] (!%p167_p9)   ;;  %v879_v8 = vld [vmem:[%s1311_s1 + $0x34] ss:$8 sps:$4 sm:$0xff] (!%p167_p9)  }
  0x10   : > { %319 = vmatprep.subr.bf16.mxu0 (!%p167_p9), %v873_v3  ;;  %v882_v6 = vld [vmem:[%s1312_s2] sm:$0xff] (!%p167_p9)   ;;  %v881_v9 = vld [vmem:[%s1311_s1 + $0x30] ss:$8 sps:$4 sm:$0xff] (!%p167_p9)   ;;  %v883_v12 = vld [vmem:[%s1312_s2 + $0x8] sm:$0xff] (!%p167_p9)   ;;  %vm292_vm0 = vcmask (!%p167_p9), 523264   ;;  %v1117_v42 = vshrl.u32 (!%p167_p9), %v234_v41, 7 }
  0x11   : > { %796 = vmatprep.subr.bf16.mxu1 (!%p167_p9), %v882_v6  ;;  %v884_v13 = vld [vmem:[%s1312_s2 + $0x10] sm:$0xff] (!%p167_p9)   ;;  %v885_v15 = vld [vmem:[%s1312_s2 + $0x18] sm:$0xff] (!%p167_p9)   ;;  %v886_v37 = vld [vmem:[%s1312_s2 + $0x20] sm:$0xff] (!%p167_p9)   ;;  %s189_s6 = sand.u32 (!%p167_p9), 1, %s944_s16   ;;  %s779_s9 = sshll.u32 (!%p167_p9), %s1004_s19, 11 }
  0x12   : > { %797 = vmatpush3.bf16.msra.mxu1 (!%p167_p9), %v882_v6  ;;  %v887_v38 = vld [vmem:[%s1312_s2 + $0x28] sm:$0xff] (!%p167_p9)   ;;  %v888_v39 = vld [vmem:[%s1312_s2 + $0x30] sm:$0xff] (!%p167_p9)   ;;  %v889_v40 = vld [vmem:[%s1312_s2 + $0x38] sm:$0xff] (!%p167_p9)   ;;  %v1120_v43 = vsub.s32 (!%p167_p9), 0, %v1117_v42  ;;  %s747_s7 = sshll.u32 (!%p167_p9), %s189_s6, 7  ;;  %s1260_s13 = scalar_lea.hbm (!%p167_p9), %s1314_s4, %s779_s9 }
  0x13   : > { %320 = vmatpush1.bf16.msra.mxu0 (!%p167_p9), %v875_v4  ;;  %798 = vmatprep.subr.bf16.mxu1 (!%p167_p9), %v883_v12  ;;  %v1125_v44 = vld [vmem:[%s1313_s3] sm:$0xf] (!%p167_p9)  ;;  %s1204_s8 = scalar_lea.vmem (!%p167_p9), [#allocation2], %s747_s7  ;;  %s1269_s19 = scalar_lea.sflag (!%p167_p9), [#allocation3], %s189_s6 }
  0x14   : > { %321 = vmatprep.subr.bf16.mxu0 (!%p167_p9), %v876_v5  ;;  %v237_v45 = vrot.slane (!%p167_p9), %v1125_v44, %v1120_v43  ;;  %s681_s10 = sshll.u32 (!%p167_p9), %s1204_s8, 4  ;;  %s955_s20 = smov (!%p167_p9), [#allocation2]   ;;  %s1262_s10 = int_to_ptr.vmem [resolvable:$true] %s681_s10 }
  0x15   : > { %s1322_s29 = smov (!%p193_p10, %s748_s29), 31  ;;  %s890_s14 = scalar_lea.vmem %s1262_s10, 2048 }
  0x16   : > { %s749_s12 = sshll.u32 %s1322_s29, 3  ;;  %799 = vmatpush3.bf16.msra.mxu1 %v883_v12  ;;  %v1130_v46 = vrot.slane %v237_v45, %v1120_v43  ;;  %p891_p11 = scmp.ne.s32.totalorder %s1262_s10, %s890_s14 }
  0x17   : > { %s1060_s5 = scalar_lea.vmem %s1310_s0, %s749_s12  ;;  %322 = vmatpush1.bf16.msra.mxu0 %v878_v7  ;;  %800 = vmatprep.subr.bf16.mxu1 %v884_v13  ;;  %s894_s22 = sshll.u32 %s955_s20, 4  ;;  %s895_s22 = int_to_ptr.vmem [resolvable:$false] %s894_s22 }
  0x18   : > { %v200_v10 = vld [vmem:[%s1060_s5] sm:$0xff]  ;;  %v201_v11 = vld [vmem:[%s1060_s5 + $0x8] sm:$0xff]  ;;  %323 = vmatprep.subr.bf16.mxu0 %v879_v8  ;;  %v202_v16 = vld [vmem:[%s1060_s5 + $0x10] sm:$0xff]  ;;  %p892_p12 = pnand %p891_p11, %p1021_p5  ;;  %s896_s23 = scalar_lea.vmem %s895_s22, 4096 }
  0x19   : > { %v216_v14 = vpack.c.bf16 %v201_v11, %v200_v10  ;;  %v203_v17 = vld [vmem:[%s1060_s5 + $0x18] sm:$0xff]  ;;  %v204_v19 = vld [vmem:[%s1060_s5 + $0x20] sm:$0xff]  ;;  %v205_v20 = vld [vmem:[%s1060_s5 + $0x28] sm:$0xff]  ;;  %p897_p0 = scmp.lt.s32.totalorder %s1262_s10, %s895_s22  ;;  %p898_p1 = scmp.lt.s32.totalorder %s896_s23, %s890_s14 }
  0x1a   : > { %801 = vmatpush3.bf16.msra.mxu1 %v884_v13  ;;  %v217_v18 = vpack.c.bf16 %v203_v17, %v202_v16  ;;  %v218_v21 = vpack.c.bf16 %v205_v20, %v204_v19  ;;  %v206_v22 = vld [vmem:[%s1060_s5 + $0x30] sm:$0xff]  ;;  %v207_v23 = vld [vmem:[%s1060_s5 + $0x38] sm:$0xff]  ;;  %v208_v25 = vld [vmem:[%s1060_s5 + $0x40] sm:$0xff]  ;;  %p893_p13 = pneg %p892_p12 }
  0x1b   : > { %324 = vmatpush1.bf16.msra.mxu0 %v881_v9  ;;  %802 = vmatprep.subr.bf16.mxu1 %v885_v15  ;;  %v219_v24 = vpack.c.bf16 %v207_v23, %v206_v22  ;;  %v209_v26 = vld [vmem:[%s1060_s5 + $0x48] sm:$0xff]  ;;  %v210_v28 = vld [vmem:[%s1060_s5 + $0x50] sm:$0xff]  ;;  %v211_v29 = vld [vmem:[%s1060_s5 + $0x58] sm:$0xff]  ;;  %p899_p2 = por %p898_p1, %p897_p0 }
  0x1c   : > { %v220_v27 = vpack.c.bf16 %v209_v26, %v208_v25  ;;  %v221_v30 = vpack.c.bf16 %v211_v29, %v210_v28  ;;  %v212_v31 = vld [vmem:[%s1060_s5 + $0x60] sm:$0xff]  ;;  %v213_v32 = vld [vmem:[%s1060_s5 + $0x68] sm:$0xff]  ;;  %v214_v34 = vld [vmem:[%s1060_s5 + $0x70] sm:$0xff] }
  0x1d   : > { %v222_v33 = vpack.c.bf16 %v213_v32, %v212_v31  ;;  %v215_v35 = vld [vmem:[%s1060_s5 + $0x78] sm:$0xff]  ;;  %p900_p3 = pnand %p899_p2, %p893_p13 }
  0x1e   : > { %758 = vmatmul.mubr.msk.bf16.vlgmr.msra.gmra.mrb[0].mxu0 %vm292_vm0, %v216_v14  ;;  %803 = vmatpush3.bf16.msra.mxu1 %v885_v15  ;;  %v223_v36 = vpack.c.bf16 %v215_v35, %v214_v34 }
  0x1f   : > { %359 = vmatprep.mubr.bf16.mxu0 %v954_v2  ;;  %804 = vmatprep.subr.bf16.mxu1 %v886_v37 }
  0x22   : > { %805 = vmatpush3.bf16.msra.mxu1 %v886_v37 }
  0x23   : > { %806 = vmatprep.subr.bf16.mxu1 %v887_v38 }
  0x26   : > { %759 = vmatmul.mubr.msk.bf16.gmra.mrb[4].mxu0 %vm292_vm0, %v217_v18  ;;  %807 = vmatpush3.bf16.msra.mxu1 %v887_v38 }
  0x27   : > { %369 = vmatprep.mubr.bf16.mxu0 %v954_v2  ;;  %808 = vmatprep.subr.bf16.mxu1 %v888_v39 }
  0x2a   : > { %809 = vmatpush3.bf16.msra.mxu1 %v888_v39 }
  0x2b   : > { %810 = vmatprep.subr.bf16.mxu1 %v889_v40 }
  0x2e   : > { %760 = vmatmul.mubr.msk.bf16.gmra.mrb[8].mxu0 %vm292_vm0, %v218_v21  ;;  %811 = vmatpush3.bf16.msra.mxu1 %v889_v40 }
  0x2f   : > { %379 = vmatprep.mubr.bf16.mxu0 %v954_v2 }
  0x36   : > { %761 = vmatmul.mubr.msk.bf16.gmra.mrb[12].mxu0 %vm292_vm0, %v219_v24 }
  0x37   : > { %389 = vmatprep.mubr.bf16.mxu0 %v954_v2 }
  0x3e   : > { %762 = vmatmul.mubr.msk.bf16.gmra.mrb[16].mxu0 %vm292_vm0, %v220_v27 }
  0x3f   : > { %399 = vmatprep.mubr.bf16.mxu0 %v954_v2 }
  0x46   : > { %763 = vmatmul.mubr.msk.bf16.gmra.mrb[20].mxu0 %vm292_vm0, %v221_v30 }
  0x47   : > { %409 = vmatprep.mubr.bf16.mxu0 %v954_v2 }
  0x4e   : > { %764 = vmatmul.mubr.msk.bf16.gmra.mrb[24].mxu0 %vm292_vm0, %v222_v33 }
  0x4f   : > { %419 = vmatprep.mubr.bf16.mxu0 %v954_v2 }
  0x56   : > { %765 = vmatmul.mubr.msk.bf16.gmra.mrb[28].mxu0 %vm292_vm0, %v223_v36 }
  0xf1   : > { %v351_v47 = vpop.f32.mrb[0].mxu0 }
  0xf2   : > { %v352_v48 = vadd.f32 %v351_v47, %v1130_v46  ;;  %v1133_v49 = vpop.f32.mrb[1].mxu0 }
  0xf3   : > { %v355_v50 = vpop.f32.mrb[2].mxu0 }
  0xf4   : > { %v356_v51 = vadd.f32 %v355_v50, %v1130_v46  ;;  %v1136_v52 = vpop.f32.mrb[3].mxu0  ;;  %v430_v53 = vmax.f32 %v352_v48, 0.0 }
  0xf6   : > { %v431_v54 = vmax.f32 %v356_v51, 0.0 }
  0xf8   : > { %v446_v55 = vpack.c.bf16 %v431_v54, %v430_v53 }
  0xf9   : > { %v361_v56 = vpop.f32.mrb[4].mxu0 }
  0xfa   : > { %v362_v57 = vadd.f32 %v361_v56, %v1130_v46  ;;  %v1139_v58 = vpop.f32.mrb[5].mxu0  ;;  %812 = vmatprep.mubr.bf16.mxu1 %v446_v55 }
  0xfb   : > { %v365_v59 = vpop.f32.mrb[6].mxu0 }
  0xfc   : > { %v366_v60 = vadd.f32 %v365_v59, %v1130_v46  ;;  %v1142_v61 = vpop.f32.mrb[7].mxu0  ;;  %v432_v62 = vmax.f32 %v362_v57, 0.0 }
  0xfe   : > { %v433_v63 = vmax.f32 %v366_v60, 0.0 }
 0x100   : > { %v447_v0 = vpack.c.bf16 %v433_v63, %v432_v62  ;;  %v240_v63 = vsub.s32 2, %v1117_v42 }
 0x101   : > { %v371_v1 = vpop.f32.mrb[8].mxu0 }
 0x102   : > { %v372_v2 = vadd.f32 %v371_v1, %v1130_v46  ;;  %v1145_v3 = vpop.f32.mrb[9].mxu0  ;;  %813 = vmatmul.mubr.bf16.vlgmr.msra.gmra.mrb[0].mxu1 %v447_v0  ;;  %v472_v0 = vsub.s32 1, %v1117_v42  ;;  %v241_v1 = vrot.slane %v1125_v44, %v240_v63 }
 0x103   : > { %v375_v4 = vpop.f32.mrb[10].mxu0 }
 0x104   : > { %v376_v5 = vadd.f32 %v375_v4, %v1130_v46  ;;  %v1148_v6 = vpop.f32.mrb[11].mxu0  ;;  %v434_v7 = vmax.f32 %v372_v2, 0.0  ;;  %v1184_v2 = vrot.slane %v1125_v44, %v472_v0  ;;  %v1187_v4 = vrot.slane %v241_v1, %v1120_v43 }
 0x106   : > { %v435_v8 = vmax.f32 %v376_v5, 0.0  ;;  %v364_v5 = vadd.f32 %v1139_v58, %v1187_v4  ;;  %v354_v42 = vadd.f32 %v1133_v49, %v1187_v4  ;;  %v368_v43 = vadd.f32 %v1142_v61, %v1187_v4 }
 0x107   : > { %v358_v58 = vadd.f32 %v1136_v52, %v1187_v4 }
 0x108   : > { %v448_v9 = vpack.c.bf16 %v435_v8, %v434_v7 }
 0x109   : > { %v381_v10 = vpop.f32.mrb[12].mxu0 }
 0x10a   : > { %v382_v11 = vadd.f32 %v381_v10, %v1130_v46  ;;  %v1151_v12 = vpop.f32.mrb[13].mxu0  ;;  %816 = vmatprep.mubr.bf16.mxu1 %v448_v9 }
 0x10b   : > { %v385_v13 = vpop.f32.mrb[14].mxu0 }
 0x10c   : > { %v386_v14 = vadd.f32 %v385_v13, %v1130_v46  ;;  %v1154_v15 = vpop.f32.mrb[15].mxu0  ;;  %v436_v16 = vmax.f32 %v382_v11, 0.0 }
 0x10e   : > { %v437_v17 = vmax.f32 %v386_v14, 0.0 }
 0x110   : > { %v449_v18 = vpack.c.bf16 %v437_v17, %v436_v16 }
 0x111   : > { %v391_v19 = vpop.f32.mrb[16].mxu0 }
 0x112   : > { %v392_v20 = vadd.f32 %v391_v19, %v1130_v46  ;;  %v1157_v21 = vpop.f32.mrb[17].mxu0  ;;  %817 = vmatmul.mubr.bf16.gmra.mrb[4].mxu1 %v449_v18 }
 0x113   : > { %v395_v22 = vpop.f32.mrb[18].mxu0 }
 0x114   : > { %v396_v23 = vadd.f32 %v395_v22, %v1130_v46  ;;  %v1160_v24 = vpop.f32.mrb[19].mxu0  ;;  %v438_v25 = vmax.f32 %v392_v20, 0.0  ;;  %v384_v22 = vadd.f32 %v1151_v12, %v1187_v4 }
 0x116   : > { %v439_v26 = vmax.f32 %v396_v23, 0.0 }
 0x118   : > { %v450_v27 = vpack.c.bf16 %v439_v26, %v438_v25  ;;  %v374_v26 = vadd.f32 %v1145_v3, %v1187_v4 }
 0x119   : > { %v401_v28 = vpop.f32.mrb[20].mxu0 }
 0x11a   : > { %v402_v29 = vadd.f32 %v401_v28, %v1130_v46  ;;  %v1163_v30 = vpop.f32.mrb[21].mxu0  ;;  %820 = vmatprep.mubr.bf16.mxu1 %v450_v27 }
 0x11b   : > { %v405_v31 = vpop.f32.mrb[22].mxu0 }
 0x11c   : > { %v406_v32 = vadd.f32 %v405_v31, %v1130_v46  ;;  %v1166_v33 = vpop.f32.mrb[23].mxu0  ;;  %v440_v34 = vmax.f32 %v402_v29, 0.0  ;;  %v388_v29 = vadd.f32 %v1154_v15, %v1187_v4 }
 0x11e   : > { %v441_v35 = vmax.f32 %v406_v32, 0.0 }
 0x120   : > { %v451_v36 = vpack.c.bf16 %v441_v35, %v440_v34  ;;  %v378_v34 = vadd.f32 %v1148_v6, %v1187_v4 }
 0x121   : > { %v411_v37 = vpop.f32.mrb[24].mxu0 }
 0x122   : > { %v412_v38 = vadd.f32 %v411_v37, %v1130_v46  ;;  %v1169_v39 = vpop.f32.mrb[25].mxu0  ;;  %821 = vmatmul.mubr.bf16.gmra.mrb[8].mxu1 %v451_v36 }
 0x123   : > { %v415_v40 = vpop.f32.mrb[26].mxu0 }
 0x124   : > { %v416_v41 = vadd.f32 %v415_v40, %v1130_v46  ;;  %v1172_v45 = vpop.f32.mrb[27].mxu0  ;;  %v442_v47 = vmax.f32 %v412_v38, 0.0 }
 0x126   : > { %v443_v48 = vmax.f32 %v416_v41, 0.0 }
 0x128   : > { %v452_v50 = vpack.c.bf16 %v443_v48, %v442_v47  ;;  %v404_v48 = vadd.f32 %v1163_v30, %v1187_v4 }
 0x129   : > { %v421_v51 = vpop.f32.mrb[28].mxu0 }
 0x12a   : > { %v422_v53 = vadd.f32 %v421_v51, %v1130_v46  ;;  %v1175_v54 = vpop.f32.mrb[29].mxu0  ;;  %824 = vmatprep.mubr.bf16.mxu1 %v452_v50  ;;  %v394_v51 = vadd.f32 %v1157_v21, %v1187_v4 }
 0x12b   : > { %v425_v55 = vpop.f32.mrb[30].mxu0 }
 0x12c   : > { %v426_v56 = vadd.f32 %v425_v55, %v1130_v46  ;;  %v1178_v57 = vpop.f32.mrb[31].mxu0  ;;  %v444_v59 = vmax.f32 %v422_v53, 0.0 }
 0x12e   : > { %v445_v60 = vmax.f32 %v426_v56, 0.0  ;;  %v408_v56 = vadd.f32 %v1166_v33, %v1187_v4 }
 0x130   : > { %v453_v62 = vpack.c.bf16 %v445_v60, %v444_v59 }
 0x132   : > { %825 = vmatmul.mubr.bf16.gmra.mrb[12].mxu1 %v453_v62  ;;  %v398_v62 = vadd.f32 %v1160_v24, %v1187_v4 }
 0x1d5   : > { %v814_v46 = vpop.f32.mrb[0].mxu1 }
 0x1d6   : > { %v565_v7 = vadd.f32 %v814_v46, %v1184_v2  ;;  %v556_v8 = vpop.f32.mrb[1].mxu1 }
 0x1d7   : > { %v557_v9 = vadd.f32 %v556_v8, %v1184_v2  ;;  %v815_v44 = vpop.f32.mrb[2].mxu1 }
 0x1d8   : > { %v621_v10 = vadd.f32 %v565_v7, %v364_v5  ;;  %v568_v11 = vadd.f32 %v815_v44, %v1184_v2  ;;  %v559_v13 = vpop.f32.mrb[3].mxu1  ;;  %v414_v44 = vadd.f32 %v1169_v39, %v1187_v4 }
 0x1d9   : > { %v619_v14 = vadd.f32 %v557_v9, %v354_v42  ;;  %v560_v16 = vadd.f32 %v559_v13, %v1184_v2  ;;  %v424_v42 = vadd.f32 %v1175_v54, %v1187_v4  ;;  %v418_v54 = vadd.f32 %v1172_v45, %v1187_v4 }
 0x1da   : > { %v637_v17 = vmax.f32 %v621_v10, 0.0  ;;  %v622_v18 = vadd.f32 %v568_v11, %v368_v43  ;;  %v428_v11 = vadd.f32 %v1178_v57, %v1187_v4 }
 0x1db   : > { %v635_v19 = vmax.f32 %v619_v14, 0.0  ;;  %v620_v49 = vadd.f32 %v560_v16, %v358_v58 }
 0x1dc   : > { %653 = vst [vmem:[%s1204_s8 + $0x10] sm:$0xff] %v637_v17  ;;  %v638_v61 = vmax.f32 %v622_v18, 0.0 }
 0x1dd   : > { %651 = vst [vmem:[%s1204_s8] sm:$0xff] %v635_v19  ;;  %v636_v20 = vmax.f32 %v620_v49, 0.0 }
 0x1de   : > { %654 = vst [vmem:[%s1204_s8 + $0x18] sm:$0xff] %v638_v61 }
 0x1df   : > { %652 = vst [vmem:[%s1204_s8 + $0x8] sm:$0xff] %v636_v20 }
 0x1e5   : > { %v818_v52 = vpop.f32.mrb[4].mxu1 }
 0x1e6   : > { %v581_v23 = vadd.f32 %v818_v52, %v1184_v2  ;;  %v572_v25 = vpop.f32.mrb[5].mxu1 }
 0x1e7   : > { %v573_v27 = vadd.f32 %v572_v25, %v1184_v2  ;;  %v819_v28 = vpop.f32.mrb[6].mxu1 }
 0x1e8   : > { %v625_v31 = vadd.f32 %v581_v23, %v384_v22  ;;  %v584_v32 = vadd.f32 %v819_v28, %v1184_v2  ;;  %v575_v12 = vpop.f32.mrb[7].mxu1 }
 0x1e9   : > { %v623_v35 = vadd.f32 %v573_v27, %v374_v26  ;;  %v576_v36 = vadd.f32 %v575_v12, %v1184_v2 }
 0x1ea   : > { %v641_v3 = vmax.f32 %v625_v31, 0.0  ;;  %v626_v37 = vadd.f32 %v584_v32, %v388_v29 }
 0x1eb   : > { %v639_v38 = vmax.f32 %v623_v35, 0.0  ;;  %v624_v40 = vadd.f32 %v576_v36, %v378_v34 }
 0x1ec   : > { %657 = vst [vmem:[%s1204_s8 + $0x30] sm:$0xff] %v641_v3  ;;  %v642_v41 = vmax.f32 %v626_v37, 0.0 }
 0x1ed   : > { %655 = vst [vmem:[%s1204_s8 + $0x20] sm:$0xff] %v639_v38  ;;  %v640_v47 = vmax.f32 %v624_v40, 0.0 }
 0x1ee   : > { %658 = vst [vmem:[%s1204_s8 + $0x38] sm:$0xff] %v642_v41 }
 0x1ef   : > { %656 = vst [vmem:[%s1204_s8 + $0x28] sm:$0xff] %v640_v47 }
 0x1f5   : > { %v822_v15 = vpop.f32.mrb[8].mxu1 }
 0x1f6   : > { %v597_v50 = vadd.f32 %v822_v15, %v1184_v2  ;;  %v588_v6 = vpop.f32.mrb[9].mxu1 }
 0x1f7   : > { %v589_v53 = vadd.f32 %v588_v6, %v1184_v2  ;;  %v823_v55 = vpop.f32.mrb[10].mxu1 }
 0x1f8   : > { %v629_v59 = vadd.f32 %v597_v50, %v404_v48  ;;  %v600_v60 = vadd.f32 %v823_v55, %v1184_v2  ;;  %v591_v30 = vpop.f32.mrb[11].mxu1 }
 0x1f9   : > { %v627_v63 = vadd.f32 %v589_v53, %v394_v51  ;;  %v592_v0 = vadd.f32 %v591_v30, %v1184_v2 }
 0x1fa   : > { %v645_v21 = vmax.f32 %v629_v59, 0.0  ;;  %v630_v1 = vadd.f32 %v600_v60, %v408_v56 }
 0x1fb   : > { %v643_v46 = vmax.f32 %v627_v63, 0.0  ;;  %v628_v5 = vadd.f32 %v592_v0, %v398_v62 }
 0x1fc   : > { %661 = vst [vmem:[%s1204_s8 + $0x50] sm:$0xff] %v645_v21  ;;  %v646_v7 = vmax.f32 %v630_v1, 0.0 }
 0x1fd   : > { %659 = vst [vmem:[%s1204_s8 + $0x40] sm:$0xff] %v643_v46  ;;  %v644_v8 = vmax.f32 %v628_v5, 0.0 }
 0x1fe   : > { %662 = vst [vmem:[%s1204_s8 + $0x58] sm:$0xff] %v646_v7 }
 0x1ff   : > { %660 = vst [vmem:[%s1204_s8 + $0x48] sm:$0xff] %v644_v8 }
 0x205   : > { %v826_v33 = vpop.f32.mrb[12].mxu1 }
 0x206   : > { %v613_v24 = vadd.f32 %v826_v33, %v1184_v2  ;;  %v604_v9 = vpop.f32.mrb[13].mxu1 }
 0x207   : > { %v605_v43 = vadd.f32 %v604_v9, %v1184_v2  ;;  %v827_v10 = vpop.f32.mrb[14].mxu1 }
 0x208   : > { %v633_v13 = vadd.f32 %v613_v24, %v424_v42  ;;  %v616_v58 = vadd.f32 %v827_v10, %v1184_v2  ;;  %v607_v14 = vpop.f32.mrb[15].mxu1 }
 0x209   : > { %v631_v16 = vadd.f32 %v605_v43, %v414_v44  ;;  %v608_v39 = vadd.f32 %v607_v14, %v1184_v2 }
 0x20a   : > { %v649_v17 = vmax.f32 %v633_v13, 0.0  ;;  %v634_v18 = vadd.f32 %v616_v58, %v428_v11 }
 0x20b   : > { %v647_v57 = vmax.f32 %v631_v16, 0.0  ;;  %v632_v19 = vadd.f32 %v608_v39, %v418_v54 }
 0x20c   : > { %665 = vst [vmem:[%s1204_s8 + $0x70] sm:$0xff] %v649_v17  ;;  %v650_v49 = vmax.f32 %v634_v18, 0.0 }
 0x20d   : > { %663 = vst [vmem:[%s1204_s8 + $0x60] sm:$0xff] %v647_v57  ;;  %v648_v45 = vmax.f32 %v632_v19, 0.0 }
 0x20e   : > { %666 = vst [vmem:[%s1204_s8 + $0x78] sm:$0xff] %v650_v49 }
 0x20f   : > { %664 = vst [vmem:[%s1204_s8 + $0x68] sm:$0xff] %v648_v45 }
 0x210   : > { %903 = shalt.err (!%p900_p3)
}
 0x211   : > { %s904_s27 = scalar_lea.hbm %s1260_s13, 2048  ;;  %s908_s5 = scalar_lea.hbm %s1314_s4, 4096 }
 0x212   : > { %p905_p4 = scmp.ne.s32.totalorder %s1260_s13, %s904_s27  ;;  %p909_p9 = scmp.lt.u32.totalorder %s1260_s13, %s1314_s4 }
 0x213   : > { %p910_p10 = scmp.lt.u32.totalorder %s908_s5, %s904_s27  ;;  %p912_p12 = scmp.lt.u32.totalorder %s904_s27, %s1260_s13 }
 0x214   : > { %p906_p7 = pnand %p905_p4, %p1021_p5 }
 0x215   : > { %p911_p11 = por %p910_p10, %p909_p9 }
 0x216   : > { %p907_p8 = pneg %p906_p7 }
 0x217   : > { %p913_p13 = por %p912_p12, %p911_p11 }
 0x219   : > { %p914_p0 = pnand %p913_p13, %p907_p8 }
 0x21b   : > { %917 = shalt.err (!%p914_p0)
}
 0x21c   : > { %s956_s7 = smov 128   ;;  %s957_s8 = smov 8  }
 0x21d   : > { %828 = dma.vmem_to_hbm [thread:$0]  (%p1021_p5), %s1262_s10, 2048, %s1260_s13, %s1269_s19, %s956_s7, %s956_s7, %s957_s8  }
 0x21e PF: > { %p834_p1 = scmp.ge.s32.totalorder %s952_s18, 2  ;;  %s696_s9 = sand.u32 1, %s940_s15  }
 0x21f   : > { %s697_s11 = scalar_lea.sflag [#allocation3], %s696_s9 }
 0x220   : > { %p831_p2 = pnand %p834_p1, %p1025_p6 }
 0x222   : > { %935 = dma.done.wait (!%p831_p2), %s697_s11, 2048  }
 0x223   : > { %937 = vsyncadd (!%p831_p2), %s697_s11, 4294965248  ;;  %p14_p3 = scmp.ge.s32.totalorder %s1008_s21, 4   ;;  %s1317_s15 = smov %s944_s16 }
 0x224   : > { %s1318_s16 = smov %s948_s17  ;;  %s1319_s17 = smov %s1019_s24 }
 0x225   : > { %s1320_s18 = smov %s1008_s21  ;;  %16 = sbr.rel (!%p14_p3) target bundleno = 3 (0x3), region = 71 }
 0x22c   :  { %702 = vsyncpa [#allocation3], 1 }
 0x22d   :  { %704 = vsyncpa [#allocation3 + $0x1], 1 }

</bundles_post_ra>
